<compile_context>
chip_gen: v6e
topology: v6e:2x2x1
jax: 0.10.0
libtpu: 0.0.40
codegen_flags: <defaults>
</compile_context>

<pallas_src>
import functools

import jax
import jax.numpy as jnp
from jax import lax
from jax.experimental import pallas as pl
from jax.experimental.pallas import tpu as pltpu

N_SINKHORN_ITERS = 100
NEG_INF = -1e30


# ----------------------------- in-kernel helpers -----------------------------
def _log_w(w):
    # masked log: padded particles have weight 0 and must not contribute.
    return jnp.where(w > 0, jnp.log(jnp.maximum(w, 1e-30)), NEG_INF)


def _lse(mat, axis):
    m = jnp.max(mat, axis=axis, keepdims=True)
    return m + jnp.log(jnp.sum(jnp.exp(mat - m), axis=axis, keepdims=True))


def _sum_last2(x):
    # (Bt, A, B) -> (Bt, 1, 1) via two single-axis reductions (safe lowering).
    return jnp.sum(jnp.sum(x, axis=2, keepdims=True), axis=1, keepdims=True)


def _col_to_row(t_col, eye):
    # (Bt, K, 1), (K, K) -> (Bt, 1, K): VPU multiply + XLU sublane-reduce.
    # Avoids an in-kernel transpose/reshape relayout.
    return jnp.sum(t_col * eye, axis=1, keepdims=True)


def _neg_cost_over_eps(u, wt):
    # u: (Bt, R, 4) rows, wt: (Bt, 4, C) columns (augmented coords built in the
    # wrapper) -> -C/eps of shape (Bt, R, C). Pure VPU broadcasts; the D=2
    # squared-distance matmul is too tiny to be worth the MXU push/pop latency.
    acc = u[:, :, 0:1] * wt[:, 0:1, :]
    for d in range(1, 4):
        acc = acc + u[:, :, d:d + 1] * wt[:, d:d + 1, :]
    return acc


# --------------------------------- the kernel --------------------------------
def sinkhorn_kernel(ux_ref, wxt_ref, a_col_ref, a_row_ref,
                    uy_ref, wyt_ref, b_row_ref, eye_n_ref, eye_m_ref,
                    out_ref, *, eps, n_iters, r_pow):
    ux = ux_ref[...]          # (Bt, N, 4)
    wxt = wxt_ref[...]        # (Bt, 4, N)
    a_col = a_col_ref[...]    # (Bt, N, 1)
    a_row = a_row_ref[...]    # (Bt, 1, N)
    uy = uy_ref[...]          # (Bt, M, 4)
    wyt = wyt_ref[...]        # (Bt, 4, M)
    b_row = b_row_ref[...]    # (Bt, 1, M)
    eye_n = eye_n_ref[...]    # (N, N)
    eye_m = eye_m_ref[...]    # (M, M)

    bt, n, _ = ux.shape
    m = uy.shape[1]

    loga_col = _log_w(a_col)
    loga_row = _log_w(a_row)
    logb_row = _log_w(b_row)

    # Loop-invariant "kernel" matrices, weights and 1/eps folded in (hoisted).
    neg_cxy = _neg_cost_over_eps(ux, wyt)           # (Bt, N, M) = -C_xy/eps
    ka_xy = loga_col + neg_cxy
    kb_xy = logb_row + neg_cxy
    k_xx = loga_row + _neg_cost_over_eps(ux, wxt)   # (Bt, N, N)
    k_yy = logb_row + _neg_cost_over_eps(uy, wyt)   # (Bt, M, M)

    fs0 = jnp.zeros((bt, n, 1), jnp.float32)   # f_xy / eps
    gs0 = jnp.zeros((bt, 1, m), jnp.float32)   # g_xy / eps
    hx0 = jnp.zeros((bt, 1, n), jnp.float32)   # symmetric potential of a (xx)
    hy0 = jnp.zeros((bt, 1, m), jnp.float32)   # symmetric potential of b (yy)

    def body(_, carry):
        fs, gs, hx, hy = carry
        # standard two-sided update for OT(a, b)
        gs = -_lse(ka_xy + fs, axis=1)          # (Bt, 1, M)
        fs = -_lse(kb_xy + gs, axis=2)          # (Bt, N, 1)
        # damped symmetric updates for the two debias terms (one lse each)
        tx = -_lse(k_xx + hx, axis=2)           # (Bt, N, 1)
        hx = 0.5 * (hx + _col_to_row(tx, eye_n))
        ty = -_lse(k_yy + hy, axis=2)           # (Bt, M, 1)
        hy = 0.5 * (hy + _col_to_row(ty, eye_m))
        return fs, gs, hx, hy

    fs, gs, hx, hy = lax.fori_loop(0, n_iters, body, (fs0, gs0, hx0, hy0))

    # OT_xy = eps(<a,fs> + <b,gs>), OT_xx = 2 eps <a,hx>, OT_yy = 2 eps <b,hy>
    # debiased divergence = OT_xy - 0.5 OT_xx - 0.5 OT_yy, normalized by R**beta
    ot = (_sum_last2(a_col * fs) + _sum_last2(b_row * gs)
          - _sum_last2(a_row * hx) - _sum_last2(b_row * hy))   # (Bt, 1, 1)
    out_ref[...] = (eps / r_pow) * ot


# --------------------------------- the wrapper --------------------------------
def _pick_block_batch(B, N, M):
    # Live working set per event inside the fused loop: ka_xy/kb_xy (N,M),
    # k_xx (N,N), k_yy (M,M) in f32 plus exp/temporary headroom (~3x). Cap Bt
    # for the tightest generation (v7x: 64 MiB physical / 32 MiB scoped VMEM).
    per_event = 4 * (2 * N * M + N * N + M * M) * 3
    bt = max(1, min(8, (6 * 1024 * 1024) // max(per_event, 1)))
    if B >= 2:
        # keep >= 2 grid steps so v7x's two TensorCores both get work
        # (the batch grid axis is marked "parallel").
        bt = min(bt, max(1, B // 2))
    return max(1, min(bt, B))


def sinkhorn_divergence(xi, ai, yj, bj, *, beta=2.0, R=0.8, epsilon=0.01):
    """xi: (B, N, 2) points, ai: (B, N) weights; yj: (B, M, 2), bj: (B, M)."""
    B, N, D = xi.shape
    M = yj.shape[1]
    assert D == 2, "Shaper point clouds are 2-D"

    # geomloss: blur = epsilon**(1/beta), temperature = blur**beta = epsilon.
    eps = float(epsilon)
    r_pow = float(R) ** float(beta)

    xi = xi.astype(jnp.float32)
    yj = yj.astype(jnp.float32)
    ai = ai.astype(jnp.float32)
    bj = bj.astype(jnp.float32)

    def augment(p):
        # u_i = (p, 0.5|p|^2, 1) ; w_j = (p, -1, -0.5|p|^2)/eps
        # so that u_i . w_j = (p_i.q_j - 0.5|p_i|^2 - 0.5|q_j|^2)/eps = -C_ij/eps
        sq = 0.5 * jnp.sum(p * p, axis=-1, keepdims=True)
        one = jnp.ones_like(sq)
        u = jnp.concatenate([p, sq, one], axis=-1)                      # (B, n, 4)
        wt = jnp.swapaxes(jnp.concatenate([p, -one, -sq], axis=-1) / eps, 1, 2)
        return u, wt                                                    # (B, 4, n)

    u_x, wt_x = augment(xi)
    u_y, wt_y = augment(yj)
    a_col = ai.reshape(B, N, 1)
    a_row = ai.reshape(B, 1, N)
    b_row = bj.reshape(B, 1, M)
    eye_n = jnp.eye(N, dtype=jnp.float32)
    eye_m = jnp.eye(M, dtype=jnp.float32)

    bt = _pick_block_batch(B, N, M)
    b_pad = -(-B // bt) * bt
    if b_pad != B:
        # pad the batch with edge copies (valid, positive weights -> no NaNs)
        pad3 = ((0, b_pad - B), (0, 0), (0, 0))
        u_x, wt_x, u_y, wt_y, a_col, a_row, b_row = [
            jnp.pad(z, pad3, mode="edge")
            for z in (u_x, wt_x, u_y, wt_y, a_col, a_row, b_row)]
    steps = b_pad // bt

    # advisory cost: the runtime is dominated by the exp passes in the loop.
    exp_elems = b_pad * N_SINKHORN_ITERS * (2 * N * M + N * N + M * M)
    cost = pl.CostEstimate(
        flops=int(10 * exp_elems),
        transcendentals=int(exp_elems),
        bytes_accessed=int(4 * (u_x.size + wt_x.size + u_y.size + wt_y.size
                                + a_col.size + a_row.size + b_row.size
                                + eye_n.size + eye_m.size + b_pad)),
    )

    kernel = functools.partial(sinkhorn_kernel, eps=eps,
                               n_iters=N_SINKHORN_ITERS, r_pow=r_pow)

    out = pl.pallas_call(
        kernel,
        out_shape=jax.ShapeDtypeStruct((b_pad, 1, 1), jnp.float32),
        grid=(steps,),
        in_specs=[
            pl.BlockSpec((bt, N, 4), lambda s: (s, 0, 0)),
            pl.BlockSpec((bt, 4, N), lambda s: (s, 0, 0)),
            pl.BlockSpec((bt, N, 1), lambda s: (s, 0, 0)),
            pl.BlockSpec((bt, 1, N), lambda s: (s, 0, 0)),
            pl.BlockSpec((bt, M, 4), lambda s: (s, 0, 0)),
            pl.BlockSpec((bt, 4, M), lambda s: (s, 0, 0)),
            pl.BlockSpec((bt, 1, M), lambda s: (s, 0, 0)),
            pl.BlockSpec((N, N), lambda s: (0, 0)),
            pl.BlockSpec((M, M), lambda s: (0, 0)),
        ],
        out_specs=pl.BlockSpec((bt, 1, 1), lambda s: (s, 0, 0)),
        compiler_params=pltpu.CompilerParams(
            dimension_semantics=("parallel",),
            vmem_limit_bytes=32 * 1024 * 1024),
        cost_estimate=cost,
    )(u_x, wt_x, a_col, a_row, u_y, wt_y, b_row, eye_n, eye_m)

    return out.reshape(b_pad)[:B]


# ------------------------ minimal Shaper-like glue (JAX) ----------------------
class CircleObservable:
    """Parameter-free observable: uniform points on a circle (deterministic)."""

    def __init__(self, radius=0.5, center=(0.0, 0.0), beta=2.0, R=0.8):
        self.radius = float(radius)
        self.center = jnp.asarray(center, jnp.float32)
        self.beta = float(beta)
        self.R = float(R)

    def sample(self, n):
        theta = 2.0 * jnp.pi * jnp.arange(n, dtype=jnp.float32) / n
        pts = self.center + self.radius * jnp.stack(
            [jnp.cos(theta), jnp.sin(theta)], axis=-1)      # (n, 2)
        wts = jnp.full((n,), 1.0 / n, jnp.float32)          # (n,)
        return pts, wts

    def get_dict(self):
        return {"radius": self.radius,
                "center": jax.device_get(self.center).tolist()}


class Shaper:
    """JAX/Pallas port of pyshaper.Shaper (evaluation path of calculate)."""

    def __init__(self, observables):
        self.observables = dict(observables)

    @staticmethod
    def batcher(events):
        # pad_sequence(batch_first=True) equivalent: zero-pad to max length.
        n_max = max(e[0].shape[0] for e in events)
        pts, wts = [], []
        for p, z in events:
            pad = n_max - p.shape[0]
            pts.append(jnp.pad(jnp.asarray(p, jnp.float32), ((0, pad), (0, 0))))
            wts.append(jnp.pad(jnp.asarray(z, jnp.float32), ((0, pad),)))
        return jnp.stack(pts), jnp.stack(wts)

    def forward(self, events, N=32, epsilon=0.01):
        xi, ai = self.batcher(events)          # (B, Nmax, 2), (B, Nmax)
        batch_size = xi.shape[0]
        min_losses, min_params = {}, {}
        for name, obs in self.observables.items():
            yj_s, bj_s = obs.sample(N)
            yj = jnp.broadcast_to(yj_s[None], (batch_size,) + yj_s.shape)
            bj = jnp.broadcast_to(bj_s[None], (batch_size,) + bj_s.shape)
            losses = sinkhorn_divergence(xi, ai, yj, bj,
                                         beta=obs.beta, R=obs.R,
                                         epsilon=epsilon)
            min_losses[name] = losses
            min_params[name] = [dict(obs.get_dict(), EMD=float(losses[i]))
                                for i in range(batch_size)]
        return min_losses, min_params

    __call__ = forward


# ------------------------------------ main ------------------------------------
if __name__ == "__main__":
    key = jax.random.PRNGKey(0)
    k1, k2, k3, k4 = jax.random.split(key, 4)

    # two small "events": (points (n_i, 2), weights (n_i,)) with n_i = 12, 16
    pts0 = jax.random.uniform(k1, (12, 2), minval=-0.8, maxval=0.8)
    w0 = jax.random.uniform(k2, (12,), minval=0.1, maxval=1.0)
    w0 = w0 / jnp.sum(w0)
    pts1 = jax.random.uniform(k3, (16, 2), minval=-0.8, maxval=0.8)
    w1 = jax.random.uniform(k4, (16,), minval=0.1, maxval=1.0)
    w1 = w1 / jnp.sum(w1)
    events = [(pts0, w0), (pts1, w1)]

    shaper = Shaper({"circle": CircleObservable(radius=0.5, beta=2.0, R=0.8)})
    min_losses, min_params = shaper(events, N=32, epsilon=0.01)

    jax.block_until_ready(min_losses["circle"])
    assert min_losses["circle"].shape == (2,)
    assert bool(jnp.all(jnp.isfinite(min_losses["circle"])))
    print("KERNEL_OK")
</pallas_src>

<mosaic_0001>
module attributes {stable_mosaic.version = 11 : i64} {
  func.func @sinkhorn_kernel(%arg0: i32, %arg1: memref<1x16x4xf32, #tpu.memory_space<vmem>>, %arg2: memref<1x4x16xf32, #tpu.memory_space<vmem>>, %arg3: memref<1x16x1xf32, #tpu.memory_space<vmem>>, %arg4: memref<1x1x16xf32, #tpu.memory_space<vmem>>, %arg5: memref<1x32x4xf32, #tpu.memory_space<vmem>>, %arg6: memref<1x4x32xf32, #tpu.memory_space<vmem>>, %arg7: memref<1x1x32xf32, #tpu.memory_space<vmem>>, %arg8: memref<16x16xf32, #tpu.memory_space<vmem>>, %arg9: memref<32x32xf32, #tpu.memory_space<vmem>>, %arg10: memref<1x1x1xf32, #tpu.memory_space<vmem>>) attributes {dimension_semantics = [#tpu.dimension_semantics<parallel>], iteration_bounds = array<i64: 2>, scalar_prefetch = 0 : i64, scratch_operands = 0 : i64, tpu.core_type = #tpu.core_type<tc>, window_params = [{transform_indices = @transform_0, window_bounds = array<i64: 1, 16, 4>}, {transform_indices = @transform_1, window_bounds = array<i64: 1, 4, 16>}, {transform_indices = @transform_2, window_bounds = array<i64: 1, 16, 1>}, {transform_indices = @transform_3, window_bounds = array<i64: 1, 1, 16>}, {transform_indices = @transform_4, window_bounds = array<i64: 1, 32, 4>}, {transform_indices = @transform_5, window_bounds = array<i64: 1, 4, 32>}, {transform_indices = @transform_6, window_bounds = array<i64: 1, 1, 32>}, {pipeline_mode = #tpu.pipeline_mode<synchronous>, transform_indices = @transform_7, window_bounds = array<i64: 16, 16>}, {pipeline_mode = #tpu.pipeline_mode<synchronous>, transform_indices = @transform_8, window_bounds = array<i64: 32, 32>}, {transform_indices = @transform_9, window_bounds = array<i64: 1, 1, 1>}]} {
    %c0 = arith.constant 0 : index
    %c0_0 = arith.constant 0 : index
    %c0_1 = arith.constant 0 : index
    %0 = vector.load %arg1[%c0, %c0_0, %c0_1] : memref<1x16x4xf32, #tpu.memory_space<vmem>>, vector<1x16x4xf32>
    %c0_2 = arith.constant 0 : index
    %c0_3 = arith.constant 0 : index
    %c0_4 = arith.constant 0 : index
    %1 = vector.load %arg2[%c0_2, %c0_3, %c0_4] : memref<1x4x16xf32, #tpu.memory_space<vmem>>, vector<1x4x16xf32>
    %c0_5 = arith.constant 0 : index
    %c0_6 = arith.constant 0 : index
    %c0_7 = arith.constant 0 : index
    %2 = vector.load %arg3[%c0_5, %c0_6, %c0_7] : memref<1x16x1xf32, #tpu.memory_space<vmem>>, vector<1x16x1xf32>
    %c0_8 = arith.constant 0 : index
    %c0_9 = arith.constant 0 : index
    %c0_10 = arith.constant 0 : index
    %3 = vector.load %arg4[%c0_8, %c0_9, %c0_10] : memref<1x1x16xf32, #tpu.memory_space<vmem>>, vector<1x1x16xf32>
    %c0_11 = arith.constant 0 : index
    %c0_12 = arith.constant 0 : index
    %c0_13 = arith.constant 0 : index
    %4 = vector.load %arg5[%c0_11, %c0_12, %c0_13] : memref<1x32x4xf32, #tpu.memory_space<vmem>>, vector<1x32x4xf32>
    %c0_14 = arith.constant 0 : index
    %c0_15 = arith.constant 0 : index
    %c0_16 = arith.constant 0 : index
    %5 = vector.load %arg6[%c0_14, %c0_15, %c0_16] : memref<1x4x32xf32, #tpu.memory_space<vmem>>, vector<1x4x32xf32>
    %c0_17 = arith.constant 0 : index
    %c0_18 = arith.constant 0 : index
    %c0_19 = arith.constant 0 : index
    %6 = vector.load %arg7[%c0_17, %c0_18, %c0_19] : memref<1x1x32xf32, #tpu.memory_space<vmem>>, vector<1x1x32xf32>
    %c0_20 = arith.constant 0 : index
    %c0_21 = arith.constant 0 : index
    %7 = vector.load %arg8[%c0_20, %c0_21] : memref<16x16xf32, #tpu.memory_space<vmem>>, vector<16x16xf32>
    %c0_22 = arith.constant 0 : index
    %c0_23 = arith.constant 0 : index
    %8 = vector.load %arg9[%c0_22, %c0_23] : memref<32x32xf32, #tpu.memory_space<vmem>>, vector<32x32xf32>
    %cst = arith.constant 0.000000e+00 : f32
    %9 = vector.broadcast %cst : f32 to vector<1x16x1xf32>
    %10 = arith.cmpf ogt, %2, %9 : vector<1x16x1xf32>
    %cst_24 = arith.constant 1.000000e-30 : f32
    %11 = vector.broadcast %cst_24 : f32 to vector<1x16x1xf32>
    %12 = arith.maximumf %2, %11 : vector<1x16x1xf32>
    %13 = math.log %12 : vector<1x16x1xf32>
    %cst_25 = arith.constant -1.000000e+30 : f32
    %14 = vector.broadcast %cst_25 : f32 to vector<1x16x1xf32>
    %15 = arith.select %10, %13, %14 : vector<1x16x1xi1>, vector<1x16x1xf32>
    %cst_26 = arith.constant 0.000000e+00 : f32
    %16 = vector.broadcast %cst_26 : f32 to vector<1x1x16xf32>
    %17 = arith.cmpf ogt, %3, %16 : vector<1x1x16xf32>
    %cst_27 = arith.constant 1.000000e-30 : f32
    %18 = vector.broadcast %cst_27 : f32 to vector<1x1x16xf32>
    %19 = arith.maximumf %3, %18 : vector<1x1x16xf32>
    %20 = math.log %19 : vector<1x1x16xf32>
    %cst_28 = arith.constant -1.000000e+30 : f32
    %21 = vector.broadcast %cst_28 : f32 to vector<1x1x16xf32>
    %22 = arith.select %17, %20, %21 : vector<1x1x16xi1>, vector<1x1x16xf32>
    %cst_29 = arith.constant 0.000000e+00 : f32
    %23 = vector.broadcast %cst_29 : f32 to vector<1x1x32xf32>
    %24 = arith.cmpf ogt, %6, %23 : vector<1x1x32xf32>
    %cst_30 = arith.constant 1.000000e-30 : f32
    %25 = vector.broadcast %cst_30 : f32 to vector<1x1x32xf32>
    %26 = arith.maximumf %6, %25 : vector<1x1x32xf32>
    %27 = math.log %26 : vector<1x1x32xf32>
    %cst_31 = arith.constant -1.000000e+30 : f32
    %28 = vector.broadcast %cst_31 : f32 to vector<1x1x32xf32>
    %29 = arith.select %24, %27, %28 : vector<1x1x32xi1>, vector<1x1x32xf32>
    %30 = vector.extract_strided_slice %0 {offsets = [0, 0, 0], sizes = [1, 16, 1], strides = [1, 1, 1]} : vector<1x16x4xf32> to vector<1x16x1xf32>
    %31 = vector.extract_strided_slice %5 {offsets = [0, 0, 0], sizes = [1, 1, 32], strides = [1, 1, 1]} : vector<1x4x32xf32> to vector<1x1x32xf32>
    %32 = vector.broadcast %30 : vector<1x16x1xf32> to vector<1x16x32xf32>
    %33 = vector.broadcast %31 : vector<1x1x32xf32> to vector<1x16x32xf32>
    %34 = arith.mulf %32, %33 : vector<1x16x32xf32>
    %35 = vector.extract_strided_slice %0 {offsets = [0, 0, 1], sizes = [1, 16, 1], strides = [1, 1, 1]} : vector<1x16x4xf32> to vector<1x16x1xf32>
    %36 = vector.extract_strided_slice %5 {offsets = [0, 1, 0], sizes = [1, 1, 32], strides = [1, 1, 1]} : vector<1x4x32xf32> to vector<1x1x32xf32>
    %37 = vector.broadcast %35 : vector<1x16x1xf32> to vector<1x16x32xf32>
    %38 = vector.broadcast %36 : vector<1x1x32xf32> to vector<1x16x32xf32>
    %39 = arith.mulf %37, %38 : vector<1x16x32xf32>
    %40 = arith.addf %34, %39 : vector<1x16x32xf32>
    %41 = vector.extract_strided_slice %0 {offsets = [0, 0, 2], sizes = [1, 16, 1], strides = [1, 1, 1]} : vector<1x16x4xf32> to vector<1x16x1xf32>
    %42 = vector.extract_strided_slice %5 {offsets = [0, 2, 0], sizes = [1, 1, 32], strides = [1, 1, 1]} : vector<1x4x32xf32> to vector<1x1x32xf32>
    %43 = vector.broadcast %41 : vector<1x16x1xf32> to vector<1x16x32xf32>
    %44 = vector.broadcast %42 : vector<1x1x32xf32> to vector<1x16x32xf32>
    %45 = arith.mulf %43, %44 : vector<1x16x32xf32>
    %46 = arith.addf %40, %45 : vector<1x16x32xf32>
    %47 = vector.extract_strided_slice %0 {offsets = [0, 0, 3], sizes = [1, 16, 1], strides = [1, 1, 1]} : vector<1x16x4xf32> to vector<1x16x1xf32>
    %48 = vector.extract_strided_slice %5 {offsets = [0, 3, 0], sizes = [1, 1, 32], strides = [1, 1, 1]} : vector<1x4x32xf32> to vector<1x1x32xf32>
    %49 = vector.broadcast %47 : vector<1x16x1xf32> to vector<1x16x32xf32>
    %50 = vector.broadcast %48 : vector<1x1x32xf32> to vector<1x16x32xf32>
    %51 = arith.mulf %49, %50 : vector<1x16x32xf32>
    %52 = arith.addf %46, %51 : vector<1x16x32xf32>
    %53 = vector.broadcast %15 : vector<1x16x1xf32> to vector<1x16x32xf32>
    %54 = arith.addf %53, %52 : vector<1x16x32xf32>
    %55 = vector.broadcast %29 : vector<1x1x32xf32> to vector<1x16x32xf32>
    %56 = arith.addf %55, %52 : vector<1x16x32xf32>
    %57 = vector.extract_strided_slice %0 {offsets = [0, 0, 0], sizes = [1, 16, 1], strides = [1, 1, 1]} : vector<1x16x4xf32> to vector<1x16x1xf32>
    %58 = vector.extract_strided_slice %1 {offsets = [0, 0, 0], sizes = [1, 1, 16], strides = [1, 1, 1]} : vector<1x4x16xf32> to vector<1x1x16xf32>
    %59 = vector.broadcast %57 : vector<1x16x1xf32> to vector<1x16x16xf32>
    %60 = vector.broadcast %58 : vector<1x1x16xf32> to vector<1x16x16xf32>
    %61 = arith.mulf %59, %60 : vector<1x16x16xf32>
    %62 = vector.extract_strided_slice %0 {offsets = [0, 0, 1], sizes = [1, 16, 1], strides = [1, 1, 1]} : vector<1x16x4xf32> to vector<1x16x1xf32>
    %63 = vector.extract_strided_slice %1 {offsets = [0, 1, 0], sizes = [1, 1, 16], strides = [1, 1, 1]} : vector<1x4x16xf32> to vector<1x1x16xf32>
    %64 = vector.broadcast %62 : vector<1x16x1xf32> to vector<1x16x16xf32>
    %65 = vector.broadcast %63 : vector<1x1x16xf32> to vector<1x16x16xf32>
    %66 = arith.mulf %64, %65 : vector<1x16x16xf32>
    %67 = arith.addf %61, %66 : vector<1x16x16xf32>
    %68 = vector.extract_strided_slice %0 {offsets = [0, 0, 2], sizes = [1, 16, 1], strides = [1, 1, 1]} : vector<1x16x4xf32> to vector<1x16x1xf32>
    %69 = vector.extract_strided_slice %1 {offsets = [0, 2, 0], sizes = [1, 1, 16], strides = [1, 1, 1]} : vector<1x4x16xf32> to vector<1x1x16xf32>
    %70 = vector.broadcast %68 : vector<1x16x1xf32> to vector<1x16x16xf32>
    %71 = vector.broadcast %69 : vector<1x1x16xf32> to vector<1x16x16xf32>
    %72 = arith.mulf %70, %71 : vector<1x16x16xf32>
    %73 = arith.addf %67, %72 : vector<1x16x16xf32>
    %74 = vector.extract_strided_slice %0 {offsets = [0, 0, 3], sizes = [1, 16, 1], strides = [1, 1, 1]} : vector<1x16x4xf32> to vector<1x16x1xf32>
    %75 = vector.extract_strided_slice %1 {offsets = [0, 3, 0], sizes = [1, 1, 16], strides = [1, 1, 1]} : vector<1x4x16xf32> to vector<1x1x16xf32>
    %76 = vector.broadcast %74 : vector<1x16x1xf32> to vector<1x16x16xf32>
    %77 = vector.broadcast %75 : vector<1x1x16xf32> to vector<1x16x16xf32>
    %78 = arith.mulf %76, %77 : vector<1x16x16xf32>
    %79 = arith.addf %73, %78 : vector<1x16x16xf32>
    %80 = vector.broadcast %22 : vector<1x1x16xf32> to vector<1x16x16xf32>
    %81 = arith.addf %80, %79 : vector<1x16x16xf32>
    %82 = vector.extract_strided_slice %4 {offsets = [0, 0, 0], sizes = [1, 32, 1], strides = [1, 1, 1]} : vector<1x32x4xf32> to vector<1x32x1xf32>
    %83 = vector.extract_strided_slice %5 {offsets = [0, 0, 0], sizes = [1, 1, 32], strides = [1, 1, 1]} : vector<1x4x32xf32> to vector<1x1x32xf32>
    %84 = vector.broadcast %82 : vector<1x32x1xf32> to vector<1x32x32xf32>
    %85 = vector.broadcast %83 : vector<1x1x32xf32> to vector<1x32x32xf32>
    %86 = arith.mulf %84, %85 : vector<1x32x32xf32>
    %87 = vector.extract_strided_slice %4 {offsets = [0, 0, 1], sizes = [1, 32, 1], strides = [1, 1, 1]} : vector<1x32x4xf32> to vector<1x32x1xf32>
    %88 = vector.extract_strided_slice %5 {offsets = [0, 1, 0], sizes = [1, 1, 32], strides = [1, 1, 1]} : vector<1x4x32xf32> to vector<1x1x32xf32>
    %89 = vector.broadcast %87 : vector<1x32x1xf32> to vector<1x32x32xf32>
    %90 = vector.broadcast %88 : vector<1x1x32xf32> to vector<1x32x32xf32>
    %91 = arith.mulf %89, %90 : vector<1x32x32xf32>
    %92 = arith.addf %86, %91 : vector<1x32x32xf32>
    %93 = vector.extract_strided_slice %4 {offsets = [0, 0, 2], sizes = [1, 32, 1], strides = [1, 1, 1]} : vector<1x32x4xf32> to vector<1x32x1xf32>
    %94 = vector.extract_strided_slice %5 {offsets = [0, 2, 0], sizes = [1, 1, 32], strides = [1, 1, 1]} : vector<1x4x32xf32> to vector<1x1x32xf32>
    %95 = vector.broadcast %93 : vector<1x32x1xf32> to vector<1x32x32xf32>
    %96 = vector.broadcast %94 : vector<1x1x32xf32> to vector<1x32x32xf32>
    %97 = arith.mulf %95, %96 : vector<1x32x32xf32>
    %98 = arith.addf %92, %97 : vector<1x32x32xf32>
    %99 = vector.extract_strided_slice %4 {offsets = [0, 0, 3], sizes = [1, 32, 1], strides = [1, 1, 1]} : vector<1x32x4xf32> to vector<1x32x1xf32>
    %100 = vector.extract_strided_slice %5 {offsets = [0, 3, 0], sizes = [1, 1, 32], strides = [1, 1, 1]} : vector<1x4x32xf32> to vector<1x1x32xf32>
    %101 = vector.broadcast %99 : vector<1x32x1xf32> to vector<1x32x32xf32>
    %102 = vector.broadcast %100 : vector<1x1x32xf32> to vector<1x32x32xf32>
    %103 = arith.mulf %101, %102 : vector<1x32x32xf32>
    %104 = arith.addf %98, %103 : vector<1x32x32xf32>
    %105 = vector.broadcast %29 : vector<1x1x32xf32> to vector<1x32x32xf32>
    %106 = arith.addf %105, %104 : vector<1x32x32xf32>
    %cst_32 = arith.constant 0.000000e+00 : f32
    %107 = vector.broadcast %cst_32 : f32 to vector<1x16x1xf32>
    %cst_33 = arith.constant 0.000000e+00 : f32
    %108 = vector.broadcast %cst_33 : f32 to vector<1x1x32xf32>
    %cst_34 = arith.constant 0.000000e+00 : f32
    %109 = vector.broadcast %cst_34 : f32 to vector<1x1x16xf32>
    %cst_35 = arith.constant 0.000000e+00 : f32
    %110 = vector.broadcast %cst_35 : f32 to vector<1x1x32xf32>
    %c0_i32 = arith.constant 0 : i32
    %c100_i32 = arith.constant 100 : i32
    %111 = arith.addi %c0_i32, %c100_i32 : i32
    %c1_i32 = arith.constant 1 : i32
    %112:4 = scf.for %arg11 = %c0_i32 to %111 step %c1_i32 iter_args(%arg12 = %107, %arg13 = %108, %arg14 = %109, %arg15 = %110) -> (vector<1x16x1xf32>, vector<1x1x32xf32>, vector<1x1x16xf32>, vector<1x1x32xf32>)  : i32 {
      %139 = vector.broadcast %arg12 : vector<1x16x1xf32> to vector<1x16x32xf32>
      %140 = arith.addf %54, %139 : vector<1x16x32xf32>
      %cst_48 = arith.constant dense<0xFF800000> : vector<1x32xf32>
      %141 = vector.multi_reduction <maximumf>, %140, %cst_48 [1] : vector<1x16x32xf32> to vector<1x32xf32>
      %142 = vector.shape_cast %141 : vector<1x32xf32> to vector<1x1x32xf32>
      %143 = vector.broadcast %142 : vector<1x1x32xf32> to vector<1x16x32xf32>
      %144 = arith.subf %140, %143 : vector<1x16x32xf32>
      %145 = math.exp %144 : vector<1x16x32xf32>
      %cst_49 = arith.constant dense<0.000000e+00> : vector<1x32xf32>
      %146 = vector.multi_reduction <add>, %145, %cst_49 [1] : vector<1x16x32xf32> to vector<1x32xf32>
      %147 = vector.shape_cast %146 : vector<1x32xf32> to vector<1x1x32xf32>
      %148 = math.log %147 : vector<1x1x32xf32>
      %149 = arith.addf %142, %148 : vector<1x1x32xf32>
      %cst_50 = arith.constant 0.000000e+00 : f32
      %150 = vector.broadcast %cst_50 : f32 to vector<1x1x32xf32>
      %151 = arith.subf %150, %149 : vector<1x1x32xf32>
      %152 = vector.broadcast %151 : vector<1x1x32xf32> to vector<1x16x32xf32>
      %153 = arith.addf %56, %152 : vector<1x16x32xf32>
      %cst_51 = arith.constant dense<0xFF800000> : vector<1x16xf32>
      %154 = vector.multi_reduction <maximumf>, %153, %cst_51 [2] : vector<1x16x32xf32> to vector<1x16xf32>
      %155 = vector.shape_cast %154 : vector<1x16xf32> to vector<1x16x1xf32>
      %156 = vector.broadcast %155 : vector<1x16x1xf32> to vector<1x16x32xf32>
      %157 = arith.subf %153, %156 : vector<1x16x32xf32>
      %158 = math.exp %157 : vector<1x16x32xf32>
      %cst_52 = arith.constant dense<0.000000e+00> : vector<1x16xf32>
      %159 = vector.multi_reduction <add>, %158, %cst_52 [2] : vector<1x16x32xf32> to vector<1x16xf32>
      %160 = vector.shape_cast %159 : vector<1x16xf32> to vector<1x16x1xf32>
      %161 = math.log %160 : vector<1x16x1xf32>
      %162 = arith.addf %155, %161 : vector<1x16x1xf32>
      %cst_53 = arith.constant 0.000000e+00 : f32
      %163 = vector.broadcast %cst_53 : f32 to vector<1x16x1xf32>
      %164 = arith.subf %163, %162 : vector<1x16x1xf32>
      %165 = vector.broadcast %arg14 : vector<1x1x16xf32> to vector<1x16x16xf32>
      %166 = arith.addf %81, %165 : vector<1x16x16xf32>
      %cst_54 = arith.constant dense<0xFF800000> : vector<1x16xf32>
      %167 = vector.multi_reduction <maximumf>, %166, %cst_54 [2] : vector<1x16x16xf32> to vector<1x16xf32>
      %168 = vector.shape_cast %167 : vector<1x16xf32> to vector<1x16x1xf32>
      %169 = vector.broadcast %168 : vector<1x16x1xf32> to vector<1x16x16xf32>
      %170 = arith.subf %166, %169 : vector<1x16x16xf32>
      %171 = math.exp %170 : vector<1x16x16xf32>
      %cst_55 = arith.constant dense<0.000000e+00> : vector<1x16xf32>
      %172 = vector.multi_reduction <add>, %171, %cst_55 [2] : vector<1x16x16xf32> to vector<1x16xf32>
      %173 = vector.shape_cast %172 : vector<1x16xf32> to vector<1x16x1xf32>
      %174 = math.log %173 : vector<1x16x1xf32>
      %175 = arith.addf %168, %174 : vector<1x16x1xf32>
      %cst_56 = arith.constant 0.000000e+00 : f32
      %176 = vector.broadcast %cst_56 : f32 to vector<1x16x1xf32>
      %177 = arith.subf %176, %175 : vector<1x16x1xf32>
      %178 = vector.shape_cast %7 : vector<16x16xf32> to vector<1x16x16xf32>
      %179 = vector.broadcast %177 : vector<1x16x1xf32> to vector<1x16x16xf32>
      %180 = arith.mulf %179, %178 : vector<1x16x16xf32>
      %cst_57 = arith.constant dense<0.000000e+00> : vector<1x16xf32>
      %181 = vector.multi_reduction <add>, %180, %cst_57 [1] : vector<1x16x16xf32> to vector<1x16xf32>
      %182 = vector.shape_cast %181 : vector<1x16xf32> to vector<1x1x16xf32>
      %183 = arith.addf %arg14, %182 : vector<1x1x16xf32>
      %cst_58 = arith.constant 5.000000e-01 : f32
      %184 = vector.broadcast %cst_58 : f32 to vector<1x1x16xf32>
      %185 = arith.mulf %184, %183 : vector<1x1x16xf32>
      %186 = vector.broadcast %arg15 : vector<1x1x32xf32> to vector<1x32x32xf32>
      %187 = arith.addf %106, %186 : vector<1x32x32xf32>
      %cst_59 = arith.constant dense<0xFF800000> : vector<1x32xf32>
      %188 = vector.multi_reduction <maximumf>, %187, %cst_59 [2] : vector<1x32x32xf32> to vector<1x32xf32>
      %189 = vector.shape_cast %188 : vector<1x32xf32> to vector<1x32x1xf32>
      %190 = vector.broadcast %189 : vector<1x32x1xf32> to vector<1x32x32xf32>
      %191 = arith.subf %187, %190 : vector<1x32x32xf32>
      %192 = math.exp %191 : vector<1x32x32xf32>
      %cst_60 = arith.constant dense<0.000000e+00> : vector<1x32xf32>
      %193 = vector.multi_reduction <add>, %192, %cst_60 [2] : vector<1x32x32xf32> to vector<1x32xf32>
      %194 = vector.shape_cast %193 : vector<1x32xf32> to vector<1x32x1xf32>
      %195 = math.log %194 : vector<1x32x1xf32>
      %196 = arith.addf %189, %195 : vector<1x32x1xf32>
      %cst_61 = arith.constant 0.000000e+00 : f32
      %197 = vector.broadcast %cst_61 : f32 to vector<1x32x1xf32>
      %198 = arith.subf %197, %196 : vector<1x32x1xf32>
      %199 = vector.shape_cast %8 : vector<32x32xf32> to vector<1x32x32xf32>
      %200 = vector.broadcast %198 : vector<1x32x1xf32> to vector<1x32x32xf32>
      %201 = arith.mulf %200, %199 : vector<1x32x32xf32>
      %cst_62 = arith.constant dense<0.000000e+00> : vector<1x32xf32>
      %202 = vector.multi_reduction <add>, %201, %cst_62 [1] : vector<1x32x32xf32> to vector<1x32xf32>
      %203 = vector.shape_cast %202 : vector<1x32xf32> to vector<1x1x32xf32>
      %204 = arith.addf %arg15, %203 : vector<1x1x32xf32>
      %cst_63 = arith.constant 5.000000e-01 : f32
      %205 = vector.broadcast %cst_63 : f32 to vector<1x1x32xf32>
      %206 = arith.mulf %205, %204 : vector<1x1x32xf32>
      scf.yield %164, %151, %185, %206 : vector<1x16x1xf32>, vector<1x1x32xf32>, vector<1x1x16xf32>, vector<1x1x32xf32>
    }
    %113 = arith.mulf %2, %112#0 : vector<1x16x1xf32>
    %cst_36 = arith.constant dense<0.000000e+00> : vector<1x16xf32>
    %114 = vector.multi_reduction <add>, %113, %cst_36 [2] : vector<1x16x1xf32> to vector<1x16xf32>
    %115 = vector.shape_cast %114 : vector<1x16xf32> to vector<1x16x1xf32>
    %cst_37 = arith.constant dense<0.000000e+00> : vector<1x1xf32>
    %116 = vector.multi_reduction <add>, %115, %cst_37 [1] : vector<1x16x1xf32> to vector<1x1xf32>
    %117 = vector.shape_cast %116 : vector<1x1xf32> to vector<1x1x1xf32>
    %118 = arith.mulf %6, %112#1 : vector<1x1x32xf32>
    %cst_38 = arith.constant dense<0.000000e+00> : vector<1x1xf32>
    %119 = vector.multi_reduction <add>, %118, %cst_38 [2] : vector<1x1x32xf32> to vector<1x1xf32>
    %120 = vector.shape_cast %119 : vector<1x1xf32> to vector<1x1x1xf32>
    %cst_39 = arith.constant dense<0.000000e+00> : vector<1x1xf32>
    %121 = vector.multi_reduction <add>, %120, %cst_39 [1] : vector<1x1x1xf32> to vector<1x1xf32>
    %122 = vector.shape_cast %121 : vector<1x1xf32> to vector<1x1x1xf32>
    %123 = arith.addf %117, %122 : vector<1x1x1xf32>
    %124 = arith.mulf %3, %112#2 : vector<1x1x16xf32>
    %cst_40 = arith.constant dense<0.000000e+00> : vector<1x1xf32>
    %125 = vector.multi_reduction <add>, %124, %cst_40 [2] : vector<1x1x16xf32> to vector<1x1xf32>
    %126 = vector.shape_cast %125 : vector<1x1xf32> to vector<1x1x1xf32>
    %cst_41 = arith.constant dense<0.000000e+00> : vector<1x1xf32>
    %127 = vector.multi_reduction <add>, %126, %cst_41 [1] : vector<1x1x1xf32> to vector<1x1xf32>
    %128 = vector.shape_cast %127 : vector<1x1xf32> to vector<1x1x1xf32>
    %129 = arith.subf %123, %128 : vector<1x1x1xf32>
    %130 = arith.mulf %6, %112#3 : vector<1x1x32xf32>
    %cst_42 = arith.constant dense<0.000000e+00> : vector<1x1xf32>
    %131 = vector.multi_reduction <add>, %130, %cst_42 [2] : vector<1x1x32xf32> to vector<1x1xf32>
    %132 = vector.shape_cast %131 : vector<1x1xf32> to vector<1x1x1xf32>
    %cst_43 = arith.constant dense<0.000000e+00> : vector<1x1xf32>
    %133 = vector.multi_reduction <add>, %132, %cst_43 [1] : vector<1x1x1xf32> to vector<1x1xf32>
    %134 = vector.shape_cast %133 : vector<1x1xf32> to vector<1x1x1xf32>
    %135 = arith.subf %129, %134 : vector<1x1x1xf32>
    %cst_44 = arith.constant 1.562500e-02 : f32
    %136 = vector.broadcast %cst_44 : f32 to vector<1x1x1xf32>
    %137 = arith.mulf %136, %135 : vector<1x1x1xf32>
    %c0_45 = arith.constant 0 : index
    %c0_46 = arith.constant 0 : index
    %c0_47 = arith.constant 0 : index
    %138 = vector.load %arg10[%c0_45, %c0_46, %c0_47] : memref<1x1x1xf32, #tpu.memory_space<vmem>>, vector<1x1x1xf32>
    tpu.vector_store %arg10[%c0_45, %c0_46, %c0_47], %137 {strides = array<i32>} : memref<1x1x1xf32, #tpu.memory_space<vmem>>, vector<1x1x1xf32>,
    return
  }
  func.func @transform_0(%arg0: i32) -> (i32, i32, i32) {
    %c0_i32 = arith.constant 0 : i32
    %c0_i32_0 = arith.constant 0 : i32
    %c0_i32_1 = arith.constant 0 : i32
    return %arg0, %c0_i32, %c0_i32_0 : i32, i32, i32
  }
  func.func @transform_1(%arg0: i32) -> (i32, i32, i32) {
    %c0_i32 = arith.constant 0 : i32
    %c0_i32_0 = arith.constant 0 : i32
    %c0_i32_1 = arith.constant 0 : i32
    return %arg0, %c0_i32, %c0_i32_0 : i32, i32, i32
  }
  func.func @transform_2(%arg0: i32) -> (i32, i32, i32) {
    %c0_i32 = arith.constant 0 : i32
    %c0_i32_0 = arith.constant 0 : i32
    %c0_i32_1 = arith.constant 0 : i32
    return %arg0, %c0_i32, %c0_i32_0 : i32, i32, i32
  }
  func.func @transform_3(%arg0: i32) -> (i32, i32, i32) {
    %c0_i32 = arith.constant 0 : i32
    %c0_i32_0 = arith.constant 0 : i32
    %c0_i32_1 = arith.constant 0 : i32
    return %arg0, %c0_i32, %c0_i32_0 : i32, i32, i32
  }
  func.func @transform_4(%arg0: i32) -> (i32, i32, i32) {
    %c0_i32 = arith.constant 0 : i32
    %c0_i32_0 = arith.constant 0 : i32
    %c0_i32_1 = arith.constant 0 : i32
    return %arg0, %c0_i32, %c0_i32_0 : i32, i32, i32
  }
  func.func @transform_5(%arg0: i32) -> (i32, i32, i32) {
    %c0_i32 = arith.constant 0 : i32
    %c0_i32_0 = arith.constant 0 : i32
    %c0_i32_1 = arith.constant 0 : i32
    return %arg0, %c0_i32, %c0_i32_0 : i32, i32, i32
  }
  func.func @transform_6(%arg0: i32) -> (i32, i32, i32) {
    %c0_i32 = arith.constant 0 : i32
    %c0_i32_0 = arith.constant 0 : i32
    %c0_i32_1 = arith.constant 0 : i32
    return %arg0, %c0_i32, %c0_i32_0 : i32, i32, i32
  }
  func.func @transform_7(%arg0: i32) -> (i32, i32) {
    %c0_i32 = arith.constant 0 : i32
    %c0_i32_0 = arith.constant 0 : i32
    %c0_i32_1 = arith.constant 0 : i32
    return %c0_i32, %c0_i32_0 : i32, i32
  }
  func.func @transform_8(%arg0: i32) -> (i32, i32) {
    %c0_i32 = arith.constant 0 : i32
    %c0_i32_0 = arith.constant 0 : i32
    %c0_i32_1 = arith.constant 0 : i32
    return %c0_i32, %c0_i32_0 : i32, i32
  }
  func.func @transform_9(%arg0: i32) -> (i32, i32, i32) {
    %c0_i32 = arith.constant 0 : i32
    %c0_i32_0 = arith.constant 0 : i32
    %c0_i32_1 = arith.constant 0 : i32
    return %arg0, %c0_i32, %c0_i32_0 : i32, i32, i32
  }
}

</mosaic_0001>

<bundles_post_ra>
// kernel: tpu_custom_call.1
= control target key start
LH: loop header
LB: loop body
LE: loop exit
PB: predicated region body
PF: predicated region fallthrough
CT: control target
= control target key end

     0   :  { %s1278_s30 = smov 0   ;;  %s1588_s0 = inlined_call_operand.vmem [shape: f32[2,16,4], index: 0, kind: input, shape index: {}]   ;;  %s1589_s1 = inlined_call_operand.vmem [shape: f32[2,4,16], index: 1, kind: input, shape index: {}]   ;;  %s1590_s2 = inlined_call_operand.vmem [shape: f32[2,16,1], index: 2, kind: input, shape index: {}]   ;;  %s1591_s3 = inlined_call_operand.vmem [shape: f32[2,1,16], index: 3, kind: input, shape index: {}]   ;;  %s1592_s4 = inlined_call_operand.vmem [shape: f32[2,32,4], index: 4, kind: input, shape index: {}]   ;;  %s1593_s5 = inlined_call_operand.vmem [shape: f32[2,4,32], index: 5, kind: input, shape index: {}]   ;;  %s1594_s6 = inlined_call_operand.vmem [shape: f32[2,1,32], index: 6, kind: input, shape index: {}]   ;;  %s1595_s7 = inlined_call_operand.vmem [shape: f32[16,16], index: 7, kind: input, shape index: {}]   ;;  %s1596_s8 = inlined_call_operand.vmem [shape: f32[32,32], index: 8, kind: input, shape index: {}]   ;;  %s1597_s9 = inlined_call_operand.vmem [shape: f32[2,1,1], index: 9, kind: output, shape index: {}]  }
   0x1 LB: > { %s1048_s10 = sadd.s32 4294967295, %s1202_s30   ;;  %p1052_p0 = scmp.ge.s32.totalorder %s1202_s30, 1  ;;  %s1202_s30 = sphi %s1278_s30, %s19_s30  }
   0x2   : > { %p341_p1 = scmp.lt.s32.totalorder %s1202_s30, 3 }
   0x4   : > { %p342_p2 = pnand %p1052_p0, %p341_p1 }
   0x5   : > { %p399_p3 = scmp.lt.s32.totalorder (!%p342_p2), %s1048_s10, 1  ;;  %s1448_s13 = smov (!%p342_p2), 0  }
   0x6   : > { %345 = sbr.rel (%p342_p2) target bundleno = 746 (0x2ea), region = 56 }
   0xb   : > { %v1224_v0 = vmov 1   ;;  %v1225_v1 = vmov 0   ;;  %s1604_s10 = smov (!%p399_p3, %s1048_s10), 1  ;;  %v1226_v7 = vmov 2   ;;  %v1227_v9 = vmov 3   ;;  %v1320_v19 = vld [vmem:[%s1595_s7] sm:$0xff] }
   0xc   : > { %1119 = vset.pattern.permute.xlu1 %v1224_v0  ;;  %1118 = vset.pattern.permute.xlu0 %v1225_v1  ;;  %s1063_s11 = sshll.u32 %s1604_s10, 4  ;;  %s430_s14 = scalar_lea.vmem %s1597_s9, %s1604_s10  ;;  %v1325_v20 = vld [vmem:[%s1595_s7 + $0x8] sm:$0xff]  ;;  %v1330_v21 = vld [vmem:[%s1596_s8] sm:$0xff]  ;;  %v1340_v24 = vld [vmem:[%s1596_s8 + $0x10] sm:$0xff]  ;;  %v479_v32 = vlaneseq }
   0xd   : > { %s403_s17 = scalar_lea.vmem %s1588_s0, %s1063_s11  ;;  %s1065_s18 = sshll.u32 %s1604_s10, 5  ;;  %v1335_v23 = vld [vmem:[%s1596_s8 + $0x8] sm:$0xff]  ;;  %v1345_v25 = vld [vmem:[%s1596_s8 + $0x18] sm:$0xff] }
   0xe   : > { %v431_v2 = vld [vmem:[%s403_s17] sm:$0xff]  ;;  %s1301_s21 = scalar_lea.vmem %s1590_s2, %s1063_s11  ;;  %v432_v3 = vld [vmem:[%s403_s17 + $0x8] sm:$0xff]  ;;  %s420_s24 = scalar_lea.vmem %s1592_s4, %s1065_s18  ;;  %v480_v35 = vshrl.u32 %v479_v32, 7 }
   0xf   : > { %486 = vperm.xlu1 %1119, %v431_v2   ;;  %471 = vperm.xlu0 %1118, %v431_v2   ;;  %v1304_v4 = vld [vmem:[%s1301_s21] sm:$0xff]  ;;  %v438_v6 = vld [vmem:[%s420_s24 + $0x8] sm:$0xff]  ;;  %v440_v10 = vld [vmem:[%s420_s24 + $0x18] sm:$0xff]  ;;  %s1055_s25 = sshll.u32 %s1604_s10, 2 }
  0x10   : > { %v451_v5 = vmax.f32 %v1304_v4, 1e-30  ;;  %v437_v8 = vld [vmem:[%s420_s24] sm:$0xff]  ;;  %v439_v12 = vld [vmem:[%s420_s24 + $0x10] sm:$0xff]  ;;  %vm449_vm0 = vcmp.gt.f32.partialorder %v1304_v4, 0.0  ;;  %v1313_v15 = vld [vmem:[%s1301_s21 + $0x8] sm:$0xff]  ;;  %s427_s21 = scalar_lea.vmem %s1594_s6, %s1604_s10  ;;  %s415_s24 = scalar_lea.vmem %s1591_s3, %s1604_s10 }
  0x11   : > { %v452_v16 = vmax.f32 %v1313_v15, 1e-30  ;;  %vm450_vm1 = vcmp.gt.f32.partialorder %v1313_v15, 0.0  ;;  %v1356_v26 = vld [vmem:[%s427_s21] sm:$0x1]  ;;  %s407_s28 = scalar_lea.vmem %s1589_s1, %s1055_s25  ;;  %s424_s12 = scalar_lea.vmem %s1593_s5, %s1055_s25  ;;  %v495_v38 = vsub.s32 1, %v480_v35 }
  0x12   : > { %1130 = vlog2.f32 %v451_v5  ;;  %v1358_v27 = vld [vmem:[%s415_s24] sm:$0x1]  ;;  %v465_v28 = vmax.f32 %v1356_v26, 1e-30  ;;  %v481_v39 = vsub.s32 0, %v480_v35  ;;  %v511_v50 = vsub.s32 2, %v480_v35 }
  0x13   : > { %490 = vperm.xlu1 %1119, %v432_v3   ;;  %476 = vperm.xlu0 %1118, %v432_v3   ;;  %1132 = vlog2.f32 %v452_v16  ;;  %v460_v29 = vmax.f32 %v1358_v27, 1e-30  ;;  %v433_v40 = vld [vmem:[%s407_s28] sm:$0xf]  ;;  %v527_v52 = vsub.s32 3, %v480_v35  ;;  %vm464_vm2 = vcmp.gt.f32.partialorder %v1356_v26, 0.0 }
  0x14   : > { %1134 = vlog2.f32 %v465_v28  ;;  %v441_v41 = vld [vmem:[%s424_s12] sm:$0xf]  ;;  %v562_v47 = vrot.slane %v433_v40, %v495_v38  ;;  %v556_v49 = vrot.slane %v433_v40, %v481_v39  ;;  %vm459_vm3 = vcmp.gt.f32.partialorder %v1358_v27, 0.0 }
  0x15   : > { %1136 = vlog2.f32 %v460_v29  ;;  %v1373_v46 = vrot.slane %v441_v41, %v495_v38  ;;  %v1375_v48 = vrot.slane %v441_v41, %v481_v39  ;;  %v1383_v60 = vrot.slane %v441_v41, %v511_v50 }
  0x16   : > { %v570_v61 = vrot.slane %v433_v40, %v511_v50  ;;  %v1385_v63 = vrot.slane %v441_v41, %v527_v52 }
  0x17   : > { %1120 = vset.pattern.permute.xlu1 %v1226_v7  ;;  %598 = vperm.xlu0 %1118, %v438_v6  }
  0x18   : > { %506 = vperm.xlu1 %1120, %v432_v3  }
  0x1b   : > { %1123 = vset.pattern.permute.xlu0 %v1224_v0 }
  0x1c   : > { %1121 = vset.pattern.permute.xlu1 %v1227_v9  ;;  %616 = vperm.xlu0 %1123, %v437_v8  }
  0x1d   : > { %518 = vperm.xlu1 %1121, %v431_v2  }
  0x1f   : > { %v1131_v11 = vpop.eup %1130 }
  0x20   : > { %628 = vperm.xlu0 %1123, %v440_v10   ;;  %v454_v13 = vmul.f32 0.6931472, %v1131_v11  ;;  %v1133_v17 = vpop.eup %1132 }
  0x21   : > { %1122 = vset.pattern.permute.xlu1 %v1225_v1  ;;  %v456_v18 = vmul.f32 0.6931472, %v1133_v17  ;;  %v1135_v42 = vpop.eup %1134 }
  0x22   : > { %593 = vperm.xlu1 %1122, %v437_v8   ;;  %v457_v14 = vsel %vm449_vm0, %v454_v13, -1e+30  ;;  %v1137_v44 = vpop.eup %1136  ;;  %v467_v51 = vmul.f32 0.6931472, %v1135_v42 }
  0x23   : > { %v458_v22 = vsel %vm450_vm1, %v456_v18, -1e+30  ;;  %v462_v54 = vmul.f32 0.6931472, %v1137_v44 }
  0x24   : > { %1125 = vset.pattern.permute.xlu0 %v1226_v7  ;;  %v468_v62 = vsel %vm464_vm2, %v467_v51, -1e+30 }
  0x25   : > { %502 = vperm.xlu0 %1125, %v431_v2  }
  0x26   : > { %603 = vperm.xlu1 %1122, %v439_v12  }
  0x29   : > { %644 = vperm.xlu0 %1125, %v438_v6  }
  0x2a   : > { %535 = vperm.xlu1 %1122, %v457_v14  }
  0x2d   : > { %1127 = vset.pattern.permute.xlu0 %v1227_v9 }
  0x2e   : > { %608 = vperm.xlu1 %1122, %v440_v10   ;;  %522 = vperm.xlu0 %1127, %v432_v3  }
  0x32   : > { %1124 = vset.pattern.permute.xlu1 %v1224_v0  ;;  %664 = vperm.xlu0 %1127, %v437_v8   ;;  %v578_v0 = vrot.slane %v433_v40, %v527_v52 }
  0x33   : > { %620 = vperm.xlu1 %1124, %v438_v6  }
  0x36   : > { %676 = vperm.xlu0 %1127, %v440_v10  }
  0x37   : > { %624 = vperm.xlu1 %1124, %v439_v12  }
  0x3b   : > { %1126 = vset.pattern.permute.xlu1 %v1226_v7 }
  0x3c   : > { %640 = vperm.xlu1 %1126, %v437_v8  }
  0x40   : > { %648 = vperm.xlu1 %1126, %v439_v12  }
  0x44   : > { %652 = vperm.xlu1 %1126, %v440_v10  }
  0x48   : > { %1128 = vset.pattern.permute.xlu1 %v1227_v9  ;;  %v1388_v9 = vrot.slane %v468_v62, %v481_v39 }
  0x49   : > { %668 = vperm.xlu1 %1128, %v438_v6  }
  0x4d   : > { %672 = vperm.xlu1 %1128, %v439_v12  }
  0x51   : > { %1129 = vset.pattern.permute.xlu1 %v1225_v1  ;;  %v463_v1 = vsel %vm459_vm3, %v462_v54, -1e+30 }
  0x52   : > { %540 = vperm.xlu1 %1129, %v458_v22   ;;  %v587_v10 = vrot.slane %v463_v1, %v481_v39 }
  0x8a   : > { %v487_v30 = vpop.permute.xlu1 %486  ;;  %v472_v31 = vpop.permute.xlu0 %471 }
  0x8b   : > { %v497_v55 = vmul.f32 %v1373_v46, %v487_v30  ;;  %v563_v56 = vmul.f32 %v562_v47, %v487_v30  ;;  %v483_v57 = vmul.f32 %v1375_v48, %v472_v31  ;;  %v557_v58 = vmul.f32 %v556_v49, %v472_v31 }
  0x8d   : > { %v499_v3 = vadd.f32 %v497_v55, %v483_v57  ;;  %v565_v5 = vadd.f32 %v563_v56, %v557_v58 }
  0x8e   : > { %v491_v33 = vpop.permute.xlu1 %490  ;;  %v477_v34 = vpop.permute.xlu0 %476 }
  0x8f   : > { %v498_v16 = vmul.f32 %v1373_v46, %v491_v33  ;;  %v564_v17 = vmul.f32 %v562_v47, %v491_v33  ;;  %v484_v18 = vmul.f32 %v1375_v48, %v477_v34  ;;  %v558_v22 = vmul.f32 %v556_v49, %v477_v34 }
  0x91   : > { %v500_v41 = vadd.f32 %v498_v16, %v484_v18  ;;  %v566_v42 = vadd.f32 %v564_v17, %v558_v22 }
  0x92   : > { %v1363_v36 = vpop.permute.xlu0 %598 }
  0x93   : > { %v507_v37 = vpop.permute.xlu1 %506 }
  0x94   : > { %v514_v32 = vmul.f32 %v1383_v60, %v507_v37  ;;  %v572_v35 = vmul.f32 %v570_v61, %v507_v37 }
  0x96   : > { %v574_v34 = vadd.f32 %v572_v35, %v566_v42 }
  0x97   : > { %v1371_v43 = vpop.permute.xlu0 %616 }
  0x98   : > { %v519_v45 = vpop.permute.xlu1 %518  ;;  %v631_v56 = vmul.f32 %v1371_v43, %v1373_v46 }
  0x99   : > { %v529_v11 = vmul.f32 %v1385_v63, %v519_v45  ;;  %v579_v12 = vmul.f32 %v578_v0, %v519_v45  ;;  %v516_v45 = vadd.f32 %v514_v32, %v500_v41 }
  0x9b   : > { %v1377_v53 = vpop.permute.xlu0 %628 }
  0x9d   : > { %v594_v59 = vpop.permute.xlu1 %593 }
  0x9e   : > { %v611_v57 = vmul.f32 %v594_v59, %v1375_v48 }
  0xa0   : > { %v503_v2 = vpop.permute.xlu0 %502  ;;  %v635_v62 = vadd.f32 %v631_v56, %v611_v57 }
  0xa1   : > { %v513_v6 = vmul.f32 %v1383_v60, %v503_v2  ;;  %v571_v7 = vmul.f32 %v570_v61, %v503_v2  ;;  %v604_v8 = vpop.permute.xlu1 %603 }
  0xa3   : > { %v515_v13 = vadd.f32 %v513_v6, %v499_v3  ;;  %v573_v14 = vadd.f32 %v571_v7, %v565_v5  ;;  %v634_v5 = vmul.f32 %v1377_v53, %v1373_v46 }
  0xa4   : > { %v645_v28 = vpop.permute.xlu0 %644 }
  0xa5   : > { %v581_v29 = vadd.f32 %v579_v12, %v573_v14  ;;  %v536_v30 = vpop.permute.xlu1 %535  ;;  %v531_v31 = vadd.f32 %v529_v11, %v515_v13  ;;  %v612_v11 = vmul.f32 %v1363_v36, %v1375_v48  ;;  %v656_v53 = vmul.f32 %v645_v28, %v1383_v60 }
  0xa7   : > { %v1394_v38 = vadd.f32 %v587_v10, %v581_v29  ;;  %v1396_v39 = vadd.f32 %v536_v30, %v531_v31  ;;  %v1399_v40 = vadd.f32 %v1388_v9, %v531_v31  ;;  %v613_v31 = vmul.f32 %v604_v8, %v1375_v48 }
  0xa9   : > { %v609_v33 = vpop.permute.xlu1 %608  ;;  %v523_v44 = vpop.permute.xlu0 %522 }
  0xaa   : > { %v530_v47 = vmul.f32 %v1385_v63, %v523_v44  ;;  %v580_v49 = vmul.f32 %v578_v0, %v523_v44  ;;  %v614_v6 = vmul.f32 %v609_v33, %v1375_v48 }
  0xac   : > { %v582_v50 = vadd.f32 %v580_v49, %v574_v34  ;;  %v532_v51 = vadd.f32 %v530_v47, %v516_v45  ;;  %v638_v13 = vadd.f32 %v634_v5, %v614_v6  ;;  %v1440_v47 = vmov 0.0  }
  0xad   : > { %v665_v58 = vpop.permute.xlu0 %664  ;;  %v1442_v49 = vmov 0.0  }
  0xae   : > { %v1402_v52 = vadd.f32 %v587_v10, %v582_v50  ;;  %v621_v37 = vpop.permute.xlu1 %620  ;;  %v1405_v54 = vadd.f32 %v1388_v9, %v532_v51  ;;  %v679_v0 = vmul.f32 %v665_v58, %v1385_v63  ;;  %v1444_v50 = vmov 0.0  }
  0xaf   : > { %v632_v10 = vmul.f32 %v621_v37, %v1373_v46  ;;  %v1446_v37 = vmov 0.0  }
  0xb1   : > { %v677_v43 = vpop.permute.xlu0 %676  ;;  %v636_v17 = vadd.f32 %v632_v10, %v612_v11 }
  0xb2   : > { %v625_v55 = vpop.permute.xlu1 %624  ;;  %v682_v16 = vmul.f32 %v677_v43, %v1385_v63 }
  0xb3   : > { %v633_v22 = vmul.f32 %v625_v55, %v1373_v46  ;;  %v660_v35 = vadd.f32 %v656_v53, %v636_v17 }
  0xb5   : > { %v637_v42 = vadd.f32 %v633_v22, %v613_v31 }
  0xb7   : > { %v641_v61 = vpop.permute.xlu1 %640 }
  0xb8   : > { %v655_v1 = vmul.f32 %v641_v61, %v1383_v60 }
  0xba   : > { %v659_v2 = vadd.f32 %v655_v1, %v635_v62 }
  0xbb   : > { %v649_v3 = vpop.permute.xlu1 %648 }
  0xbc   : > { %v683_v7 = vadd.f32 %v679_v0, %v659_v2  ;;  %v657_v32 = vmul.f32 %v649_v3, %v1383_v60 }
  0xbe   : > { %v1417_v59 = vadd.f32 %v683_v7, %v1388_v9  ;;  %v661_v28 = vadd.f32 %v657_v32, %v637_v42 }
  0xbf   : > { %v653_v12 = vpop.permute.xlu1 %652 }
  0xc0   : > { %v658_v14 = vmul.f32 %v653_v12, %v1383_v60 }
  0xc2   : > { %v662_v18 = vadd.f32 %v658_v14, %v638_v13 }
  0xc4   : > { %v686_v29 = vadd.f32 %v682_v16, %v662_v18  ;;  %v669_v30 = vpop.permute.xlu1 %668 }
  0xc5   : > { %v680_v36 = vmul.f32 %v669_v30, %v1385_v63 }
  0xc6   : > { %v1429_v41 = vadd.f32 %v686_v29, %v1388_v9 }
  0xc7   : > { %v684_v33 = vadd.f32 %v680_v36, %v660_v35 }
  0xc8   : > { %v673_v44 = vpop.permute.xlu1 %672 }
  0xc9   : > { %v1432_v45 = vadd.f32 %v684_v33, %v1388_v9  ;;  %v681_v46 = vmul.f32 %v673_v44, %v1385_v63 }
  0xcb   : > { %v685_v34 = vadd.f32 %v681_v46, %v661_v28 }
  0xcd   : > { %v1436_v48 = vadd.f32 %v685_v34, %v1388_v9  ;;  %v541_v60 = vpop.permute.xlu1 %540 }
  0xce   : > { %v1438_v8 = vadd.f32 %v541_v60, %v532_v51 }
  0xcf LB: >> { %vm704_vm4 = vcmask 261120   ;;  %v803_v63 = vadd.f32 %v1206_v47, %v1417_v59  ;;  %v805_v9 = vadd.f32 %v1206_v47, %v1436_v48  ;;  %v1467_v51 = vadd.f32 %v1206_v47, %v1432_v45  ;;  %s696_s13 = sadd.s32 1, %s1222_s13   ;;  %s1222_s13 = sphi %s1448_s13, %s696_s13   ;;  %v1218_v37 = vphi %v1446_v37, %v1602_v37   ;;  %v1214_v50 = vphi %v1444_v50, %v1601_v50   ;;  %v1210_v49 = vphi %v1442_v49, %v1600_v49   ;;  %v1206_v47 = vphi %v1440_v47, %v1599_v47  }
  0xd0   : >> { %v1471_v55 = vadd.f32 %v1210_v49, %v1394_v38  ;;  %vm763_vm5 = vcmask 130048   ;;  %v702_v58 = vadd.f32 %v1218_v37, %v1396_v39  ;;  %v703_v61 = vadd.f32 %v1214_v50, %v1438_v8  ;;  %p693_p4 = scmp.ge.s32.totalorder %s696_s13, 100  }
  0xd1   : >> { %v807_v56 = vsel %vm704_vm4, %v803_v63, -inf  ;;  %v813_v57 = vsel %vm704_vm4, %v805_v9, -inf  ;;  %v810_v62 = vsel %vm704_vm4, %v1467_v51, -inf  ;;  %v1483_v0 = vadd.f32 %v1210_v49, %v1402_v52 }
  0xd2   : >> { %808 = vmax.xlane.f32.xlu0 %v807_v56  ;;  %814 = vmax.xlane.f32.xlu1 %v813_v57  ;;  %v764_v1 = vsel %vm763_vm5, %v1471_v55, -inf  ;;  %v1487_v2 = vadd.f32 %v1206_v47, %v1429_v41  ;;  %v705_v3 = vsel %vm704_vm4, %v702_v58, -inf  ;;  %v706_v5 = vsel %vm704_vm4, %v703_v61, -inf }
  0xd3   : >> { %v707_v6 = vmax.f32 %v705_v3, %v706_v5  ;;  %v767_v7 = vsel %vm763_vm5, %v1483_v0, -inf  ;;  %vm893_vm6 = vcmask (%p693_p4), 253952   ;;  %vm900_vm7 = vcmask (%p693_p4), 122880  }
  0xd4   : >> { %v816_v10 = vsel %vm704_vm4, %v1487_v2, -inf  ;;  %vm882_vm8 = vcmask (%p693_p4), 7168   ;;  %vm913_vm9 = vcmask (%p693_p4), 0  }
  0xd5   : >> { %v708_v43 = vrot.slane %v707_v6, 4 }
  0xd6   : >> { %811 = vmax.xlane.f32.xlu0 %v810_v62  ;;  %765 = vmax.xlane.f32.xlu1 %v764_v1 }
  0xd7   : >> { %v709_v11 = vmax.f32 %v707_v6, %v708_v43 }
  0xd9   : >> { %v710_v12 = vrot.slane %v709_v11, 2 }
  0xda   : >> { %768 = vmax.xlane.f32.xlu0 %v767_v7  ;;  %817 = vmax.xlane.f32.xlu1 %v816_v10 }
  0xdb   : >> { %v711_v13 = vmax.f32 %v709_v11, %v710_v12 }
  0xdd   : >> { %v712_v14 = vrot.slane %v711_v13, 1 }
  0xdf   : >> { %v713_v16 = vmax.f32 %v711_v13, %v712_v14 }
  0xe1   : >> { %v714_v53 = vsub.f32 %v702_v58, %v713_v16  ;;  %v715_v17 = vsub.f32 %v703_v61, %v713_v16 }
  0xe3   : >> { %v716_v18 = vmul.f32 1.442695, %v714_v53  ;;  %v718_v22 = vmul.f32 1.442695, %v715_v17 }
  0xe5   : >> { %1138 = vpow2.f32 %v716_v18 }
  0xe6   : >> { %1140 = vpow2.f32 %v718_v22 }
  0xf2   : >> { %v1139_v29 = vpop.eup %1138 }
  0xf3   : >> { %v1141_v30 = vpop.eup %1140  ;;  %v720_v31 = vsel %vm704_vm4, %v1139_v29, 0.0 }
  0xf4   : >> { %v721_v32 = vsel %vm704_vm4, %v1141_v30, 0.0 }
  0xf5   : >> { %v722_v35 = vadd.f32 %v721_v32, %v720_v31 }
  0xf7   : >> { %v723_v36 = vrot.slane %v722_v35, 4 }
  0xf9   : >> { %v724_v42 = vadd.f32 %v723_v36, %v722_v35 }
  0xfb   : >> { %v725_v33 = vrot.slane %v724_v42, 2 }
  0xfd   : >> { %v726_v44 = vadd.f32 %v725_v33, %v724_v42 }
  0xff   : >> { %v727_v28 = vrot.slane %v726_v44, 1 }
 0x101   : >> { %v728_v46 = vadd.f32 %v727_v28, %v726_v44 }
 0x103   : >> { %1142 = vlog2.f32 %v728_v46 }
 0x110   : >> { %v1143_v34 = vpop.eup %1142 }
 0x111   : >> { %v730_v60 = vmul.f32 0.6931472, %v1143_v34 }
 0x113   : >> { %v731_v50 = vadd.f32 %v730_v60, %v713_v16 }
 0x115   : >> { %v1497_v37 = vsub.f32 0.0, %v731_v50 }
 0x117   : >> { %v1598_v56 = vmov %v1497_v37 }
 0x118   : >> { %v734_v57 = vadd.f32 %v1598_v56, %v1405_v54  ;;  %v733_v58 = vadd.f32 %v1598_v56, %v1399_v40 }
 0x11a   : >> { %v738_v61 = vsel %vm704_vm4, %v734_v57, -inf  ;;  %v735_v62 = vsel %vm704_vm4, %v733_v58, -inf }
 0x11b   : >> { %739 = vmax.xlane.f32.xlu1 %v738_v61  ;;  %736 = vmax.xlane.f32.xlu0 %v735_v62 }
 0x15b   : >> { %v1505_v1 = vpop.xlane.xlu0 %808  ;;  %v1507_v3 = vpop.xlane.xlu1 %814 }
 0x15c   : >> { %v819_v5 = vsub.f32 %v803_v63, %v1505_v1  ;;  %v821_v6 = vsub.f32 %v805_v9, %v1507_v3 }
 0x15e   : >> { %v823_v7 = vmul.f32 1.442695, %v819_v5  ;;  %v827_v10 = vmul.f32 1.442695, %v821_v6 }
 0x15f   : >> { %v1511_v43 = vpop.xlane.xlu0 %811  ;;  %v1513_v11 = vpop.xlane.xlu1 %765 }
 0x160   : >> { %1144 = vpow2.f32 %v823_v7  ;;  %v820_v12 = vsub.f32 %v1467_v51, %v1511_v43  ;;  %v770_v13 = vsub.f32 %v1471_v55, %v1513_v11 }
 0x161   : >> { %1146 = vpow2.f32 %v827_v10 }
 0x162   : >> { %v825_v14 = vmul.f32 1.442695, %v820_v12  ;;  %v772_v16 = vmul.f32 1.442695, %v770_v13 }
 0x163   : >> { %v1519_v53 = vpop.xlane.xlu0 %768  ;;  %v1521_v63 = vpop.xlane.xlu1 %817 }
 0x164   : >> { %1148 = vpow2.f32 %v825_v14  ;;  %v771_v9 = vsub.f32 %v1483_v0, %v1519_v53  ;;  %v822_v17 = vsub.f32 %v1487_v2, %v1521_v63 }
 0x165   : >> { %1150 = vpow2.f32 %v772_v16 }
 0x166   : >> { %v774_v18 = vmul.f32 1.442695, %v771_v9  ;;  %v829_v51 = vmul.f32 1.442695, %v822_v17 }
 0x168   : >> { %1152 = vpow2.f32 %v774_v18 }
 0x169   : >> { %1154 = vpow2.f32 %v829_v51 }
 0x16d   : >> { %v1145_v55 = vpop.eup %1144 }
 0x16e   : >> { %v1147_v22 = vpop.eup %1146  ;;  %v831_v29 = vsel %vm704_vm4, %v1145_v55, 0.0 }
 0x16f   : >> { %832 = vadd.xlane.f32.xlu0 %v831_v29  ;;  %v837_v30 = vsel %vm704_vm4, %v1147_v22, 0.0 }
 0x171   : >> { %v1149_v31 = vpop.eup %1148 }
 0x172   : >> { %v1151_v32 = vpop.eup %1150  ;;  %v834_v35 = vsel %vm704_vm4, %v1149_v31, 0.0 }
 0x173   : >> { %838 = vadd.xlane.f32.xlu0 %v837_v30  ;;  %835 = vadd.xlane.f32.xlu1 %v834_v35  ;;  %v776_v0 = vsel %vm763_vm5, %v1151_v32, 0.0 }
 0x175   : >> { %v1153_v2 = vpop.eup %1152 }
 0x176   : >> { %v1155_v36 = vpop.eup %1154  ;;  %v779_v42 = vsel %vm763_vm5, %v1153_v2, 0.0 }
 0x177   : >> { %777 = vadd.xlane.f32.xlu1 %v776_v0  ;;  %780 = vadd.xlane.f32.xlu0 %v779_v42  ;;  %v840_v33 = vsel %vm704_vm4, %v1155_v36, 0.0 }
 0x17b   : >> { %841 = vadd.xlane.f32.xlu1 %v840_v33 }
 0x1a4   : >> { %v1533_v44 = vpop.xlane.xlu1 %739  ;;  %v1535_v28 = vpop.xlane.xlu0 %736 }
 0x1a5   : >> { %v742_v46 = vsub.f32 %v734_v57, %v1533_v44  ;;  %v741_v34 = vsub.f32 %v733_v58, %v1535_v28 }
 0x1a7   : >> { %v745_v60 = vmul.f32 1.442695, %v742_v46  ;;  %v743_v50 = vmul.f32 1.442695, %v741_v34 }
 0x1a9   : >> { %1156 = vpow2.f32 %v745_v60 }
 0x1aa   : >> { %1158 = vpow2.f32 %v743_v50 }
 0x1b6   : >> { %v1157_v37 = vpop.eup %1156 }
 0x1b7   : >> { %v1159_v61 = vpop.eup %1158  ;;  %v750_v62 = vsel %vm704_vm4, %v1157_v37, 0.0 }
 0x1b8   : >> { %751 = vadd.xlane.f32.xlu1 %v750_v62  ;;  %v747_v5 = vsel %vm704_vm4, %v1159_v61, 0.0 }
 0x1b9   : >> { %748 = vadd.xlane.f32.xlu0 %v747_v5 }
 0x1f8   : >> { %v833_v6 = vpop.xlane.xlu0 %832 }
 0x1f9   : >> { %1160 = vlog2.f32 %v833_v6 }
 0x1fc   : >> { %v836_v7 = vpop.xlane.xlu1 %835  ;;  %v839_v10 = vpop.xlane.xlu0 %838 }
 0x1fd   : >> { %1162 = vlog2.f32 %v836_v7 }
 0x1fe   : >> { %1164 = vlog2.f32 %v839_v10 }
 0x200   : >> { %v778_v57 = vpop.xlane.xlu1 %777  ;;  %v781_v58 = vpop.xlane.xlu0 %780 }
 0x201   : >> { %1166 = vlog2.f32 %v778_v57 }
 0x202   : >> { %1168 = vlog2.f32 %v781_v58 }
 0x204   : >> { %v842_v12 = vpop.xlane.xlu1 %841 }
 0x205   : >> { %1170 = vlog2.f32 %v842_v12 }
 0x206   : >> { %v1161_v13 = vpop.eup %1160 }
 0x207   : >> { %v844_v14 = vmul.f32 0.6931472, %v1161_v13 }
 0x209   : >> { %v851_v16 = vadd.f32 %v844_v14, %v1505_v1 }
 0x20a   : >> { %v1163_v9 = vpop.eup %1162 }
 0x20b   : >> { %v1165_v17 = vpop.eup %1164  ;;  %v846_v18 = vmul.f32 0.6931472, %v1163_v9  ;;  %v855_v55 = vsub.f32 0.0, %v851_v16 }
 0x20c   : >> { %v848_v51 = vmul.f32 0.6931472, %v1165_v17 }
 0x20d   : >> { %v852_v22 = vadd.f32 %v846_v18, %v1511_v43  ;;  %v859_v2 = vmul.f32 %v855_v55, %v1330_v21 }
 0x20e   : >> { %v1167_v29 = vpop.eup %1166  ;;  %v853_v30 = vadd.f32 %v848_v51, %v1507_v3 }
 0x20f   : >> { %v1169_v31 = vpop.eup %1168  ;;  %v856_v32 = vsub.f32 0.0, %v852_v22  ;;  %v783_v35 = vmul.f32 0.6931472, %v1167_v29  ;;  %v863_v3 = vsel %vm704_vm4, %v859_v2, 0.0 }
 0x210   : >> { %v785_v0 = vmul.f32 0.6931472, %v1169_v31  ;;  %v857_v42 = vsub.f32 0.0, %v853_v30 }
 0x211   : >> { %v860_v36 = vmul.f32 %v856_v32, %v1335_v23  ;;  %v786_v1 = vadd.f32 %v783_v35, %v1513_v11 }
 0x212   : >> { %v1171_v33 = vpop.eup %1170  ;;  %v787_v46 = vadd.f32 %v785_v0, %v1519_v53  ;;  %v861_v37 = vmul.f32 %v857_v42, %v1340_v24 }
 0x213   : >> { %v864_v34 = vsel %vm704_vm4, %v860_v36, 0.0  ;;  %v788_v43 = vsub.f32 0.0, %v786_v1  ;;  %v850_v60 = vmul.f32 0.6931472, %v1171_v33 }
 0x214   : >> { %v789_v50 = vsub.f32 0.0, %v787_v46  ;;  %v865_v5 = vadd.f32 %v864_v34, %v863_v3  ;;  %v866_v10 = vsel %vm704_vm4, %v861_v37, 0.0 }
 0x215   : >> { %v790_v61 = vmul.f32 %v788_v43, %v1320_v19  ;;  %v854_v62 = vadd.f32 %v850_v60, %v1521_v63 }
 0x216   : >> { %v791_v6 = vmul.f32 %v789_v50, %v1325_v20  ;;  %v867_v12 = vadd.f32 %v866_v10, %v865_v5 }
 0x217   : >> { %v792_v11 = vsel %vm763_vm5, %v790_v61, 0.0  ;;  %v858_v7 = vsub.f32 0.0, %v854_v62 }
 0x218   : >> { %v793_v53 = vsel %vm763_vm5, %v791_v6, 0.0 }
 0x219   : >> { %v794_v57 = vadd.f32 %v793_v53, %v792_v11  ;;  %v862_v58 = vmul.f32 %v858_v7, %v1345_v25 }
 0x21b   : >> { %v795_v13 = vrot.slane %v794_v57, 4  ;;  %v868_v14 = vsel %vm704_vm4, %v862_v58, 0.0 }
 0x21c   : >> { %v869_v16 = vadd.f32 %v868_v14, %v867_v12 }
 0x21d   : >> { %v796_v9 = vadd.f32 %v795_v13, %v794_v57 }
 0x21e   : >> { %v870_v63 = vrot.slane %v869_v16, 4 }
 0x21f   : >> { %v797_v17 = vrot.slane %v796_v9, 2 }
 0x220   : >> { %v871_v18 = vadd.f32 %v870_v63, %v869_v16 }
 0x221   : >> { %v798_v51 = vadd.f32 %v797_v17, %v796_v9 }
 0x222   : >> { %v872_v55 = vrot.slane %v871_v18, 2 }
 0x223   : >> { %v799_v22 = vrot.slane %v798_v51, 1 }
 0x224   : >> { %v873_v29 = vadd.f32 %v872_v55, %v871_v18 }
 0x225   : >> { %v800_v30 = vadd.f32 %v799_v22, %v798_v51 }
 0x226   : >> { %v874_v31 = vrot.slane %v873_v29, 1 }
 0x227   : >> { %v801_v32 = vadd.f32 %v1210_v49, %v800_v30 }
 0x228   : >> { %v875_v35 = vadd.f32 %v874_v31, %v873_v29 }
 0x229   : >> { %v802_v0 = vmul.f32 0.5, %v801_v32  }
 0x22a   : >> { %v876_v2 = vadd.f32 %v1206_v47, %v875_v35 }
 0x22b   : >> { %v1600_v49 = vmov %v802_v0 }
 0x22c   : >> { %v877_v36 = vmul.f32 0.5, %v876_v2  }
 0x22e   : >> { %v1599_v47 = vmov %v877_v36 }
 0x241   : >> { %v752_v42 = vpop.xlane.xlu1 %751 }
 0x242   : >> { %1172 = vlog2.f32 %v752_v42  ;;  %v749_v1 = vpop.xlane.xlu0 %748 }
 0x243   : >> { %1174 = vlog2.f32 %v749_v1 }
 0x24f   : >> { %v1173_v33 = vpop.eup %1172 }
 0x250   : >> { %v1175_v46 = vpop.eup %1174  ;;  %v756_v34 = vmul.f32 0.6931472, %v1173_v33 }
 0x251   : >> { %v754_v43 = vmul.f32 0.6931472, %v1175_v46 }
 0x252   : >> { %v758_v60 = vadd.f32 %v756_v34, %v1533_v44  ;;  %v892_v44 = vmul.f32 (%p693_p4), %v1598_v56, %v1356_v26 }
 0x253   : >> { %v757_v50 = vadd.f32 %v754_v43, %v1535_v28  ;;  %695 = sbr.rel (!%p693_p4) target bundleno = 207 (0xcf), region = 111  ;;  %v899_v28 = vmul.f32 (%p693_p4), %v802_v0, %v1358_v27 }
 0x254   : >> { %v760_v3 = vsub.f32 0.0, %v758_v60   ;;  %v894_v62 = vsel (%p693_p4), %vm893_vm6, %v892_v44, 0.0 }
 0x255   : >> { %v759_v61 = vsub.f32 0.0, %v757_v50   ;;  %895 = vadd.xlane.f32.xlu0 (%p693_p4), %v894_v62  ;;  %v901_v6 = vsel (%p693_p4), %vm900_vm7, %v899_v28, 0.0 }
 0x256   : >> { %v1601_v50 = vmov %v760_v3  ;;  %v879_v7 = vmul.f32 (%p693_p4), %v760_v3, %v1313_v15 }
 0x257   : >> { %v1602_v37 = vmov %v759_v61  ;;  %v878_v11 = vmul.f32 (%p693_p4), %v759_v61, %v1304_v4 }
 0x258   : > { %v906_v37 = vmul.f32 %v877_v36, %v1356_v26  ;;  %v884_v20 = vsel %vm882_vm8, %v879_v7, 0.0 }
 0x259   : > { %902 = vadd.xlane.f32.xlu0 %v901_v6  ;;  %v883_v19 = vsel %vm882_vm8, %v878_v11, 0.0 }
 0x25a   : > { %v907_v5 = vsel %vm893_vm6, %v906_v37, 0.0  ;;  %v885_v21 = vadd.f32 %v884_v20, %v883_v19 }
 0x25b   : > { %908 = vadd.xlane.f32.xlu1 %v907_v5 }
 0x25c   : > { %v886_v23 = vrot.slane %v885_v21, 4 }
 0x25e   : > { %v887_v24 = vadd.f32 %v886_v23, %v885_v21 }
 0x260   : > { %v888_v25 = vrot.slane %v887_v24, 2 }
 0x262   : > { %v889_v27 = vadd.f32 %v888_v25, %v887_v24 }
 0x264   : > { %v890_v26 = vrot.slane %v889_v27, 1 }
 0x266   : > { %v891_v38 = vadd.f32 %v890_v26, %v889_v27 }
 0x2de   : > { %v896_v39 = vpop.xlane.xlu0 %895 }
 0x2df   : > { %v898_v40 = vadd.f32 %v896_v39, %v891_v38 }
 0x2e2   : > { %v903_v52 = vpop.xlane.xlu0 %902 }
 0x2e3   : > { %v905_v59 = vsub.f32 %v898_v40, %v903_v52 }
 0x2e4   : > { %v909_v54 = vpop.xlane.xlu1 %908 }
 0x2e5   : > { %v911_v41 = vsub.f32 %v905_v59, %v909_v54 }
 0x2e7   : > { %v912_v4 = vmul.f32 0.015625, %v911_v41 }
 0x2e9   : > { %914 = vst.msk [vmem:[%s430_s14] sm:$0x1] %vm913_vm9, %v912_v4 }
 0x2ea PF: > { %s19_s30 = sadd.s32 1, %s1202_s30  }
 0x2eb   : > { %p16_p5 = scmp.ge.s32.totalorder %s19_s30, 4  }
 0x2ed   :  { %18 = sbr.rel (!%p16_p5) target bundleno = 1 (0x1), region = 122 }

</bundles_post_ra>
